<compile_context>
chip_gen: v7x
topology: tpu7x:2x2x1
jax: 0.10.0
libtpu: 0.0.40
codegen_flags: <defaults>
</compile_context>

<pallas_src>
import jax
import jax.numpy as jnp
from jax.experimental import pallas as pl
from jax.experimental.pallas import tpu as pltpu

_LANES = 512  # wide, lane-dense last dim (multiple of 128)


def _cdiv(a: int, b: int) -> int:
    return -(-a // b)


def _tile_sum_kernel(x_ref, acc_ref):
    """Pass 1: per-tile partial sum accumulated into a resident (1,1) f32 output."""
    @pl.when(pl.program_id(0) == 0)
    def _init():
        acc_ref[...] = jnp.zeros_like(acc_ref)

    x = x_ref[...].astype(jnp.float32)
    part = jnp.sum(x, axis=1, keepdims=True)      # lane reduce   -> (tile_rows, 1)
    part = jnp.sum(part, axis=0, keepdims=True)   # sublane reduce -> (1, 1)
    acc_ref[...] += part


def _subtract_kernel(mean_ref, x_ref, o_ref):
    """Pass 2: o = x - mean, mean comes from SMEM (scalar prefetch)."""
    m = mean_ref[0]  # f32 scalar
    o_ref[...] = (x_ref[...].astype(jnp.float32) - m).astype(o_ref.dtype)


def centered_layer(x: jax.Array) -> jax.Array:
    """Equivalent of CenbterdLayer.forward: X - X.mean() (mean over all elements)."""
    orig_shape = x.shape
    n = int(x.size)
    itemsize = int(jnp.dtype(x.dtype).itemsize)

    # Row-tile must respect the sublane tiling for the dtype (8 for 4B, 16 for 2B, 32 for 1B).
    sublane_mult = {4: 8, 2: 16, 1: 32}.get(itemsize, 8)

    rows = _cdiv(n, _LANES)
    rows_rounded = _cdiv(rows, sublane_mult) * sublane_mult
    tile_rows = min(512, rows_rounded)                 # ~1 MiB f32 tiles
    num_tiles = _cdiv(rows_rounded, tile_rows)
    rows_padded = num_tiles * tile_rows

    flat = x.reshape(-1)
    pad = rows_padded * _LANES - n
    if pad:
        # Zero padding: contributes 0 to the sum; excluded from the divisor below.
        flat = jnp.pad(flat, (0, pad))
    x2d = flat.reshape(rows_padded, _LANES)

    # ---- Pass 1: global sum (tiled, pipelined, resident accumulator) ----
    total = pl.pallas_call(
        _tile_sum_kernel,
        out_shape=jax.ShapeDtypeStruct((1, 1), jnp.float32),
        grid_spec=pltpu.PrefetchScalarGridSpec(
            num_scalar_prefetch=0,
            grid=(num_tiles,),
            in_specs=[pl.BlockSpec((tile_rows, _LANES), lambda i: (i, 0))],
            out_specs=pl.BlockSpec((1, 1), lambda i: (0, 0)),
        ),
        compiler_params=pltpu.CompilerParams(
            dimension_semantics=("arbitrary",),  # accumulator resident across grid
        ),
        cost_estimate=pl.CostEstimate(
            flops=n, transcendentals=0, bytes_accessed=n * itemsize + 4
        ),
    )(x2d)

    # Mean uses the TRUE element count (padding excluded).
    mean_arr = (total * (1.0 / float(n))).reshape(1).astype(jnp.float32)

    # ---- Pass 2: subtract mean (tiled, "parallel" axis -> megacore on v7x) ----
    out2d = pl.pallas_call(
        _subtract_kernel,
        out_shape=jax.ShapeDtypeStruct((rows_padded, _LANES), x.dtype),
        grid_spec=pltpu.PrefetchScalarGridSpec(
            num_scalar_prefetch=1,  # mean -> SMEM
            grid=(num_tiles,),
            in_specs=[pl.BlockSpec((tile_rows, _LANES), lambda i, mean: (i, 0))],
            out_specs=pl.BlockSpec((tile_rows, _LANES), lambda i, mean: (i, 0)),
        ),
        compiler_params=pltpu.CompilerParams(
            dimension_semantics=("parallel",),
        ),
        cost_estimate=pl.CostEstimate(
            flops=n, transcendentals=0, bytes_accessed=2 * n * itemsize
        ),
    )(mean_arr, x2d)

    return out2d.reshape(-1)[:n].reshape(orig_shape)


if __name__ == "__main__":
    key = jax.random.PRNGKey(0)
    # NCHW input, small shape consistent with a conv-style tensor.
    x = jax.random.normal(key, (2, 4, 16, 16), dtype=jnp.float32)

    y = centered_layer(x)
    jax.block_until_ready(y)

    # Reference check in plain JAX.
    y_ref = x - jnp.mean(x)
    assert y.shape == x.shape and y.dtype == x.dtype
    assert jnp.allclose(y, y_ref, atol=1e-5, rtol=1e-5)
    # Centered output should have (near-)zero mean.
    assert abs(float(jnp.mean(y))) < 1e-5

    print("KERNEL_OK")
</pallas_src>

<mosaic_0001>
module attributes {stable_mosaic.version = 11 : i64} {
  func.func @_tile_sum_kernel(%arg0: i32, %arg1: memref<8x512xf32, #tpu.memory_space<vmem>>, %arg2: memref<1x1xf32, #tpu.memory_space<vmem>>) attributes {dimension_semantics = [#tpu.dimension_semantics<arbitrary>], iteration_bounds = array<i64: 1>, scalar_prefetch = 0 : i64, scratch_operands = 0 : i64, tpu.core_type = #tpu.core_type<tc>, window_params = [{transform_indices = @transform_0, window_bounds = array<i64: 8, 512>}, {pipeline_mode = #tpu.pipeline_mode<synchronous>, transform_indices = @transform_1, window_bounds = array<i64: 1, 1>}]} {
    %c0_i32 = arith.constant 0 : i32
    %0 = arith.cmpi eq, %arg0, %c0_i32 : i32
    %1 = arith.extui %0 : i1 to i32
    %c0_i32_0 = arith.constant 0 : i32
    %2 = arith.cmpi ne, %1, %c0_i32_0 : i32
    scf.if %2 {
      %cst_7 = arith.constant 0.000000e+00 : f32
      %11 = vector.broadcast %cst_7 : f32 to vector<1x1xf32>
      %c0_8 = arith.constant 0 : index
      %c0_9 = arith.constant 0 : index
      %12 = vector.load %arg2[%c0_8, %c0_9] : memref<1x1xf32, #tpu.memory_space<vmem>>, vector<1x1xf32>
      tpu.vector_store %arg2[%c0_8, %c0_9], %11 {strides = array<i32>} : memref<1x1xf32, #tpu.memory_space<vmem>>, vector<1x1xf32>,
    } else {
    }
    %c0 = arith.constant 0 : index
    %c0_1 = arith.constant 0 : index
    %3 = vector.load %arg1[%c0, %c0_1] : memref<8x512xf32, #tpu.memory_space<vmem>>, vector<8x512xf32>
    %cst = arith.constant dense<0.000000e+00> : vector<8xf32>
    %4 = vector.multi_reduction <add>, %3, %cst [1] : vector<8x512xf32> to vector<8xf32>
    %5 = vector.shape_cast %4 : vector<8xf32> to vector<8x1xf32>
    %cst_2 = arith.constant dense<0.000000e+00> : vector<1xf32>
    %6 = vector.multi_reduction <add>, %5, %cst_2 [0] : vector<8x1xf32> to vector<1xf32>
    %7 = vector.shape_cast %6 : vector<1xf32> to vector<1x1xf32>
    %c0_3 = arith.constant 0 : index
    %c0_4 = arith.constant 0 : index
    %8 = vector.load %arg2[%c0_3, %c0_4] : memref<1x1xf32, #tpu.memory_space<vmem>>, vector<1x1xf32>
    %9 = arith.addf %8, %7 : vector<1x1xf32>
    %c0_5 = arith.constant 0 : index
    %c0_6 = arith.constant 0 : index
    %10 = vector.load %arg2[%c0_5, %c0_6] : memref<1x1xf32, #tpu.memory_space<vmem>>, vector<1x1xf32>
    tpu.vector_store %arg2[%c0_5, %c0_6], %9 {strides = array<i32>} : memref<1x1xf32, #tpu.memory_space<vmem>>, vector<1x1xf32>,
    return
  }
  func.func @transform_0(%arg0: i32) -> (i32, i32) {
    %c0_i32 = arith.constant 0 : i32
    %c0_i32_0 = arith.constant 0 : i32
    return %arg0, %c0_i32 : i32, i32
  }
  func.func @transform_1(%arg0: i32) -> (i32, i32) {
    %c0_i32 = arith.constant 0 : i32
    %c0_i32_0 = arith.constant 0 : i32
    %c0_i32_1 = arith.constant 0 : i32
    return %c0_i32, %c0_i32_0 : i32, i32
  }
}

</mosaic_0001>

<bundles_post_ra>
// kernel: tpu_custom_call.1
= control target key start
LH: loop header
LB: loop body
LE: loop exit
PB: predicated region body
PF: predicated region fallthrough
CT: control target
= control target key end

     0   :  { %6 = vsyncpa [#allocation3], 0  ;;  %s151_s0 = inlined_call_operand.hbm [shape: f32[8,512], index: 0, kind: input, shape index: {}]   ;;  %s152_s1 = inlined_call_operand.hbm [shape: f32[1,1], index: 1, kind: output, shape index: {}]  }
   0x1   :  { %7 = vsyncpa [#allocation4], 0  ;;  %s112_s6 = smov [#allocation2]   ;;  %s64_s10 = scalar_lea.hbm %s151_s0, 512 }
   0x2   :  { %s14_s7 = sshll.u32 %s112_s6, 4  ;;  %p65_p0 = scmp.ne.s32.totalorder %s151_s0, %s64_s10  ;;  %s15_s7 = int_to_ptr.vmem [resolvable:$true] %s14_s7 }
   0x3   :  { %p68_p1 = scmp.lt.u32.totalorder %s64_s10, %s151_s0 }
   0x5   :  { %p70_p2 = pnand %p68_p1, %p65_p0 }
   0x7   :  { %73 = shalt.err (!%p70_p2)
}
   0x8   :  { %s74_s15 = scalar_lea.vmem %s15_s7, 512  ;;  %p79_p4 = scmp.lt.s32.totalorder %s15_s7, %s15_s7 }
   0x9   :  { %p75_p3 = scmp.ne.s32.totalorder %s15_s7, %s74_s15  ;;  %p80_p5 = scmp.lt.s32.totalorder %s74_s15, %s74_s15 }
   0xb   :  { %p81_p6 = por %p80_p5, %p79_p4 }
   0xd   :  { %p82_p7 = pnand %p81_p6, %p75_p3 }
   0xf   :  { %85 = shalt.err (!%p82_p7)
}
  0x10   :  { %17 = dma.hbm_to_vmem [thread:$0]  %s151_s0, 512, %s15_s7, [#allocation3]  }
  0x11   :  { %108 = dma.done.wait [#allocation3], 512  }
  0x12   :  { %109 = vsyncadd [#allocation3], 4294966784  ;;  %vm25_vm0 = vcmask 0   ;;  %v113_v0 = vmov 0.0   ;;  %v27_v1 = vld [vmem:[#allocation2] sm:$0xff]  ;;  %v28_v2 = vld [vmem:[#allocation2 + $0x8] sm:$0xff] }
  0x13   :  { %26 = vst.msk [vmem:[#allocation5] sm:$0x1] %vm25_vm0, %v113_v0  ;;  %v29_v3 = vld [vmem:[#allocation2 + $0x10] sm:$0xff]  ;;  %v31_v4 = vadd.f32 %v28_v2, %v27_v1  ;;  %v30_v5 = vld [vmem:[#allocation2 + $0x18] sm:$0xff]  ;;  %s114_s0 = smov [#allocation5]  }
  0x14   :  { %s52_s18 = sshll.u32 %s114_s0, 4  ;;  %s53_s18 = int_to_ptr.vmem [resolvable:$true] %s52_s18 }
  0x15   :  { %v32_v6 = vadd.f32 %v31_v4, %v29_v3  ;;  %s86_s19 = scalar_lea.vmem %s53_s18, 16  ;;  %s90_s20 = scalar_lea.vmem %s53_s18, 32 }
  0x16   :  { %p87_p8 = scmp.ne.s32.totalorder %s53_s18, %s86_s19  ;;  %p91_p9 = scmp.lt.s32.totalorder %s53_s18, %s53_s18 }
  0x17   :  { %v33_v7 = vadd.f32 %v32_v6, %v30_v5  ;;  %p92_p10 = scmp.lt.s32.totalorder %s90_s20, %s86_s19 }
  0x19   :  { %34 = vadd.xlane.f32.xlu0 %v33_v7  ;;  %p93_p11 = por %p92_p10, %p91_p9 }
  0x1a   :  { %v42_v14 = vld [vmem:[#allocation5] sm:$0x1] }
  0x1b   :  { %p94_p12 = pnand %p93_p11, %p87_p8 }
  0xa6   :  { %v35_v8 = vpop.xlane.xlu0 %34 }
  0xa7   :  { %v36_v9 = vrot.slane %v35_v8, 4 }
  0xa9   :  { %v37_v10 = vadd.f32 %v36_v9, %v35_v8 }
  0xab   :  { %v38_v11 = vrot.slane %v37_v10, 2 }
  0xad   :  { %v39_v12 = vadd.f32 %v38_v11, %v37_v10 }
  0xaf   :  { %v40_v13 = vrot.slane %v39_v12, 1 }
  0xb1   :  { %v41_v15 = vadd.f32 %v40_v13, %v39_v12 }
  0xb3   :  { %v43_v16 = vadd.f32 %v42_v14, %v41_v15 }
  0xb5   :  { %45 = vst.msk [vmem:[#allocation5] sm:$0x1] %vm25_vm0, %v43_v16 }
  0xb6   :  { %97 = shalt.err (!%p94_p12)
}
  0xb7   :  { %s98_s23 = scalar_lea.hbm %s152_s1, 16 }
  0xb8   :  { %p99_p13 = scmp.ne.s32.totalorder %s152_s1, %s98_s23  ;;  %p102_p0 = scmp.lt.u32.totalorder %s98_s23, %s152_s1 }
  0xba   :  { %p104_p1 = pnand %p102_p0, %p99_p13 }
  0xbc   :  { %107 = shalt.err (!%p104_p1)
}
  0xbd   :  { %55 = dma.vmem_to_hbm [thread:$0]  %s53_s18, 16, %s152_s1, [#allocation4]  }
  0xbe   :  { %110 = dma.done.wait [#allocation4], 16  }
  0xbf   :  { %111 = vsyncadd [#allocation4], 4294967280 }
  0xc0   :  { %59 = vsyncpa [#allocation3], 1 }
  0xc1   :  { %60 = vsyncpa [#allocation4], 1 }

</bundles_post_ra>
